<compile_context>
chip_gen: v7x
topology: tpu7x:2x2x1
jax: 0.10.0
libtpu: 0.0.40
codegen_flags: <defaults>
</compile_context>

<pallas_src>
import jax
import jax.numpy as jnp
from jax import lax
from jax.experimental import pallas as pl
from jax.experimental.pallas import tpu as pltpu


_TB = 512  # batch tile width (lane-dense output slab, multiple of 128)


def _fused_kernel(idx_ref, wa_ref, wba_ref, wcb_ref, out_ref, wab_n, wcb_n):
    """One TB-wide batch tile of the forward pass.

    idx_ref : (1, 8, TB) int32  merged index tile (rows 0..2 = a, b, c)
    wa_ref  : (N, 1)     f32    raw Marginal weights (resident)
    wba_ref : (N, N)     f32    raw P(B|A) weights   (resident)
    wcb_ref : (N, N)     f32    raw P(C|B) weights   (resident)
    out_ref : (1, 1, TB) f32    lane-dense output slab
    wab_n   : (N, N)     f32    scratch: log P(A=i) + log P(B=j|A=i)
    wcb_n   : (N, N)     f32    scratch: log P(C=j|B=i)
    """

    # ----- one-time normalisation + marginal fold (grid is sequential) -----
    @pl.when(pl.program_id(0) == 0)
    def _():
        def _row_log_normalize(w):  # rows: stable logsumexp over the lane axis
            m = jnp.max(w, axis=1, keepdims=True)
            return w - (m + jnp.log(jnp.sum(jnp.exp(w - m), axis=1, keepdims=True)))

        wa = wa_ref[...]                                   # (N, 1)
        m = jnp.max(wa, axis=0, keepdims=True)
        wa_norm = wa - (m + jnp.log(jnp.sum(jnp.exp(wa - m), axis=0, keepdims=True)))
        wab_n[...] = _row_log_normalize(wba_ref[...]) + wa_norm   # fold marginal
        wcb_n[...] = _row_log_normalize(wcb_ref[...])

    n = wab_n.shape[0]
    tb = out_ref.shape[-1]

    # ----- per-tile gather -----
    rows = idx_ref[0]                                      # (8, TB) int32
    a = rows[0:1, :]                                       # (1, TB)
    b = rows[1:2, :]
    c = rows[2:3, :]

    row_ids = lax.broadcasted_iota(jnp.int32, (n, tb), 0)  # (N, TB)
    oh_a = (a == row_ids).astype(jnp.float32)              # one-hot over A
    oh_b = (b == row_ids).astype(jnp.float32)              # one-hot over B
    oh_c = (c == row_ids).astype(jnp.float32)              # one-hot over C

    # cols_ab[i, t] = log P(A=i) + log P(B=b_t | A=i)
    # cols_cb[i, t] = log P(C=c_t | B=i)
    cols_ab = jnp.dot(wab_n[...], oh_b,
                      precision=lax.Precision.HIGHEST,
                      preferred_element_type=jnp.float32)  # (N, TB)
    cols_cb = jnp.dot(wcb_n[...], oh_c,
                      precision=lax.Precision.HIGHEST,
                      preferred_element_type=jnp.float32)  # (N, TB)

    # Single cross-sublane reduce selecting row a_t / b_t respectively.
    out_ref[0] = jnp.sum(oh_a * cols_ab + oh_b * cols_cb, axis=0, keepdims=True)


def model_causal_forward(w_a, w_b_a, w_c_b, inputs, *, tb=_TB):
    """Pallas equivalent of ModelCausal.forward.

    w_a    : (N,)   float32  (Marginal p_A weights)
    w_b_a  : (N, N) float32  (Conditional p_B_A weights: row = cond A)
    w_c_b  : (N, N) float32  (Conditional p_C_B weights: row = cond B)
    inputs : (B, 3) int32    (columns A, B, C)
    returns: (B,)   float32
    """
    N = w_b_a.shape[0]
    B = inputs.shape[0]

    wa_col = w_a.reshape(N, 1).astype(jnp.float32)
    wba = w_b_a.astype(jnp.float32)
    wcb = w_c_b.astype(jnp.float32)

    num_tiles = pl.cdiv(B, tb)
    b_pad = num_tiles * tb

    # Merged index tensor: (num_tiles, 8, TB); rows 0..2 = a, b, c.
    idx = jnp.pad(inputs.astype(jnp.int32), ((0, b_pad - B), (0, 0)))  # pad with 0
    idx = idx.T.reshape(3, num_tiles, tb).transpose(1, 0, 2)           # (T, 3, TB)
    idx = jnp.pad(idx, ((0, 0), (0, 5), (0, 0)))                       # (T, 8, TB)

    cost = pl.CostEstimate(
        flops=4 * b_pad * N * N + 12 * b_pad * N + 6 * N * N,
        transcendentals=2 * (N * N + N),
        bytes_accessed=4 * (2 * N * N + N + 9 * b_pad),
    )

    out = pl.pallas_call(
        _fused_kernel,
        out_shape=jax.ShapeDtypeStruct((num_tiles, 1, tb), jnp.float32),
        grid=(num_tiles,),
        in_specs=[
            pl.BlockSpec((1, 8, tb), lambda t: (t, 0, 0)),  # merged indices
            pl.BlockSpec((N, 1), lambda t: (0, 0)),         # w_a     (resident)
            pl.BlockSpec((N, N), lambda t: (0, 0)),         # w_b_a   (resident)
            pl.BlockSpec((N, N), lambda t: (0, 0)),         # w_c_b   (resident)
        ],
        out_specs=pl.BlockSpec((1, 1, tb), lambda t: (t, 0, 0)),
        scratch_shapes=[
            pltpu.VMEM((N, N), jnp.float32),   # wab_n = log P(A) + log P(B|A)
            pltpu.VMEM((N, N), jnp.float32),   # wcb_n = log P(C|B)
        ],
        # "arbitrary": the grid must run sequentially so the pl.when(step==0)
        # normalisation into scratch is visible to every later step.
        compiler_params=pltpu.CompilerParams(
            dimension_semantics=("arbitrary",)),
        cost_estimate=cost,
    )(idx, wa_col, wba, wcb)

    return out.reshape(b_pad)[:B]


def model_causal_reference(w_a, w_b_a, w_c_b, inputs):
    """Pure-JAX reference mirroring the PyTorch ModelCausal.forward."""
    a = inputs[:, 0]
    b = inputs[:, 1]
    c = inputs[:, 2]
    log_p_a = w_a[a] - jax.scipy.special.logsumexp(w_a)
    log_p_b_a = w_b_a[a, b] - jax.scipy.special.logsumexp(w_b_a[a], axis=1)
    log_p_c_b = w_c_b[b, c] - jax.scipy.special.logsumexp(w_c_b[b], axis=1)
    return log_p_a + log_p_b_a + log_p_c_b


if __name__ == "__main__":
    N = 16   # number of discrete states
    B = 8    # batch size

    key = jax.random.PRNGKey(0)
    kwa, kwba, kwcb, kin = jax.random.split(key, 4)

    # Module initialises weights to zeros; random values exercise the
    # normalisation + gather paths meaningfully.
    w_a = jax.random.normal(kwa, (N,), dtype=jnp.float32)
    w_b_a = jax.random.normal(kwba, (N, N), dtype=jnp.float32)
    w_c_b = jax.random.normal(kwcb, (N, N), dtype=jnp.float32)
    inputs = jax.random.randint(kin, (B, 3), 0, N, dtype=jnp.int32)

    out = model_causal_forward(w_a, w_b_a, w_c_b, inputs)
    jax.block_until_ready(out)

    ref = model_causal_reference(w_a, w_b_a, w_c_b, inputs)
    assert out.shape == (B,)
    assert jnp.allclose(out, ref, atol=1e-5, rtol=1e-5), (out, ref)

    print("KERNEL_OK")
</pallas_src>

<mosaic_0001>
module attributes {stable_mosaic.version = 11 : i64} {
  func.func @_fused_kernel(%arg0: i32, %arg1: memref<1x8x512xi32, #tpu.memory_space<vmem>>, %arg2: memref<16x1xf32, #tpu.memory_space<vmem>>, %arg3: memref<16x16xf32, #tpu.memory_space<vmem>>, %arg4: memref<16x16xf32, #tpu.memory_space<vmem>>, %arg5: memref<1x1x512xf32, #tpu.memory_space<vmem>>, %arg6: memref<16x16xf32, #tpu.memory_space<vmem>>, %arg7: memref<16x16xf32, #tpu.memory_space<vmem>>) attributes {dimension_semantics = [#tpu.dimension_semantics<arbitrary>], iteration_bounds = array<i64: 1>, scalar_prefetch = 0 : i64, scratch_operands = 2 : i64, tpu.core_type = #tpu.core_type<tc>, window_params = [{transform_indices = @transform_0, window_bounds = array<i64: 1, 8, 512>}, {pipeline_mode = #tpu.pipeline_mode<synchronous>, transform_indices = @transform_1, window_bounds = array<i64: 16, 1>}, {pipeline_mode = #tpu.pipeline_mode<synchronous>, transform_indices = @transform_2, window_bounds = array<i64: 16, 16>}, {pipeline_mode = #tpu.pipeline_mode<synchronous>, transform_indices = @transform_3, window_bounds = array<i64: 16, 16>}, {transform_indices = @transform_4, window_bounds = array<i64: 1, 1, 512>}]} {
    %c0_i32 = arith.constant 0 : i32
    %0 = arith.cmpi eq, %arg0, %c0_i32 : i32
    %1 = arith.extui %0 : i1 to i32
    %c0_i32_0 = arith.constant 0 : i32
    %2 = arith.cmpi ne, %1, %c0_i32_0 : i32
    scf.if %2 {
      %c0_12 = arith.constant 0 : index
      %c0_13 = arith.constant 0 : index
      %33 = vector.load %arg2[%c0_12, %c0_13] : memref<16x1xf32, #tpu.memory_space<vmem>>, vector<16x1xf32>
      %cst_14 = arith.constant dense<0xFF800000> : vector<1xf32>
      %34 = vector.multi_reduction <maximumf>, %33, %cst_14 [0] : vector<16x1xf32> to vector<1xf32>
      %35 = vector.shape_cast %34 : vector<1xf32> to vector<1x1xf32>
      %36 = vector.broadcast %35 : vector<1x1xf32> to vector<16x1xf32>
      %37 = arith.subf %33, %36 : vector<16x1xf32>
      %38 = math.exp %37 : vector<16x1xf32>
      %cst_15 = arith.constant dense<0.000000e+00> : vector<1xf32>
      %39 = vector.multi_reduction <add>, %38, %cst_15 [0] : vector<16x1xf32> to vector<1xf32>
      %40 = vector.shape_cast %39 : vector<1xf32> to vector<1x1xf32>
      %41 = math.log %40 : vector<1x1xf32>
      %42 = arith.addf %35, %41 : vector<1x1xf32>
      %43 = vector.broadcast %42 : vector<1x1xf32> to vector<16x1xf32>
      %44 = arith.subf %33, %43 : vector<16x1xf32>
      %c0_16 = arith.constant 0 : index
      %c0_17 = arith.constant 0 : index
      %45 = vector.load %arg3[%c0_16, %c0_17] : memref<16x16xf32, #tpu.memory_space<vmem>>, vector<16x16xf32>
      %cst_18 = arith.constant dense<0xFF800000> : vector<16xf32>
      %46 = vector.multi_reduction <maximumf>, %45, %cst_18 [1] : vector<16x16xf32> to vector<16xf32>
      %47 = vector.shape_cast %46 : vector<16xf32> to vector<16x1xf32>
      %48 = vector.broadcast %47 : vector<16x1xf32> to vector<16x16xf32>
      %49 = arith.subf %45, %48 : vector<16x16xf32>
      %50 = math.exp %49 : vector<16x16xf32>
      %cst_19 = arith.constant dense<0.000000e+00> : vector<16xf32>
      %51 = vector.multi_reduction <add>, %50, %cst_19 [1] : vector<16x16xf32> to vector<16xf32>
      %52 = vector.shape_cast %51 : vector<16xf32> to vector<16x1xf32>
      %53 = math.log %52 : vector<16x1xf32>
      %54 = arith.addf %47, %53 : vector<16x1xf32>
      %55 = vector.broadcast %54 : vector<16x1xf32> to vector<16x16xf32>
      %56 = arith.subf %45, %55 : vector<16x16xf32>
      %57 = vector.broadcast %44 : vector<16x1xf32> to vector<16x16xf32>
      %58 = arith.addf %56, %57 : vector<16x16xf32>
      %c0_20 = arith.constant 0 : index
      %c0_21 = arith.constant 0 : index
      %59 = vector.load %arg6[%c0_20, %c0_21] : memref<16x16xf32, #tpu.memory_space<vmem>>, vector<16x16xf32>
      tpu.vector_store %arg6[%c0_20, %c0_21], %58 {strides = array<i32>} : memref<16x16xf32, #tpu.memory_space<vmem>>, vector<16x16xf32>,
      %c0_22 = arith.constant 0 : index
      %c0_23 = arith.constant 0 : index
      %60 = vector.load %arg4[%c0_22, %c0_23] : memref<16x16xf32, #tpu.memory_space<vmem>>, vector<16x16xf32>
      %cst_24 = arith.constant dense<0xFF800000> : vector<16xf32>
      %61 = vector.multi_reduction <maximumf>, %60, %cst_24 [1] : vector<16x16xf32> to vector<16xf32>
      %62 = vector.shape_cast %61 : vector<16xf32> to vector<16x1xf32>
      %63 = vector.broadcast %62 : vector<16x1xf32> to vector<16x16xf32>
      %64 = arith.subf %60, %63 : vector<16x16xf32>
      %65 = math.exp %64 : vector<16x16xf32>
      %cst_25 = arith.constant dense<0.000000e+00> : vector<16xf32>
      %66 = vector.multi_reduction <add>, %65, %cst_25 [1] : vector<16x16xf32> to vector<16xf32>
      %67 = vector.shape_cast %66 : vector<16xf32> to vector<16x1xf32>
      %68 = math.log %67 : vector<16x1xf32>
      %69 = arith.addf %62, %68 : vector<16x1xf32>
      %70 = vector.broadcast %69 : vector<16x1xf32> to vector<16x16xf32>
      %71 = arith.subf %60, %70 : vector<16x16xf32>
      %c0_26 = arith.constant 0 : index
      %c0_27 = arith.constant 0 : index
      %72 = vector.load %arg7[%c0_26, %c0_27] : memref<16x16xf32, #tpu.memory_space<vmem>>, vector<16x16xf32>
      tpu.vector_store %arg7[%c0_26, %c0_27], %71 {strides = array<i32>} : memref<16x16xf32, #tpu.memory_space<vmem>>, vector<16x16xf32>,
    } else {
    }
    %c0 = arith.constant 0 : index
    %c0_1 = arith.constant 0 : index
    %c0_2 = arith.constant 0 : index
    %3 = vector.load %arg1[%c0, %c0_1, %c0_2] : memref<1x8x512xi32, #tpu.memory_space<vmem>>, vector<1x8x512xi32>
    %4 = vector.shape_cast %3 : vector<1x8x512xi32> to vector<8x512xi32>
    %5 = vector.extract_strided_slice %4 {offsets = [0, 0], sizes = [1, 512], strides = [1, 1]} : vector<8x512xi32> to vector<1x512xi32>
    %6 = vector.extract_strided_slice %4 {offsets = [1, 0], sizes = [1, 512], strides = [1, 1]} : vector<8x512xi32> to vector<1x512xi32>
    %7 = vector.extract_strided_slice %4 {offsets = [2, 0], sizes = [1, 512], strides = [1, 1]} : vector<8x512xi32> to vector<1x512xi32>
    %8 = tpu.iota {dimensions = array<i32: 0>} : vector<16x512xi32>
    %9 = vector.broadcast %5 : vector<1x512xi32> to vector<16x512xi32>
    %10 = arith.cmpi eq, %9, %8 : vector<16x512xi32>
    %11 = arith.extui %10 : vector<16x512xi1> to vector<16x512xi32>
    %12 = arith.sitofp %11 : vector<16x512xi32> to vector<16x512xf32>
    %13 = vector.broadcast %6 : vector<1x512xi32> to vector<16x512xi32>
    %14 = arith.cmpi eq, %13, %8 : vector<16x512xi32>
    %15 = arith.extui %14 : vector<16x512xi1> to vector<16x512xi32>
    %16 = arith.sitofp %15 : vector<16x512xi32> to vector<16x512xf32>
    %17 = vector.broadcast %7 : vector<1x512xi32> to vector<16x512xi32>
    %18 = arith.cmpi eq, %17, %8 : vector<16x512xi32>
    %19 = arith.extui %18 : vector<16x512xi1> to vector<16x512xi32>
    %20 = arith.sitofp %19 : vector<16x512xi32> to vector<16x512xf32>
    %c0_3 = arith.constant 0 : index
    %c0_4 = arith.constant 0 : index
    %21 = vector.load %arg6[%c0_3, %c0_4] : memref<16x16xf32, #tpu.memory_space<vmem>>, vector<16x16xf32>
    %cst = arith.constant dense<0.000000e+00> : vector<16x512xf32>
    %22 = tpu.matmul %21, %16, %cst {dimension_numbers = #tpu.dot_dimension_numbers<[1], [0], [0], [1], [0, 0, 1, 1], [], []>, precision = #tpu.contract_precision<fp32>} : vector<16x16xf32>, vector<16x512xf32>, vector<16x512xf32> -> vector<16x512xf32>
    %c0_5 = arith.constant 0 : index
    %c0_6 = arith.constant 0 : index
    %23 = vector.load %arg7[%c0_5, %c0_6] : memref<16x16xf32, #tpu.memory_space<vmem>>, vector<16x16xf32>
    %cst_7 = arith.constant dense<0.000000e+00> : vector<16x512xf32>
    %24 = tpu.matmul %23, %20, %cst_7 {dimension_numbers = #tpu.dot_dimension_numbers<[1], [0], [0], [1], [0, 0, 1, 1], [], []>, precision = #tpu.contract_precision<fp32>} : vector<16x16xf32>, vector<16x512xf32>, vector<16x512xf32> -> vector<16x512xf32>
    %25 = arith.mulf %12, %22 : vector<16x512xf32>
    %26 = arith.mulf %16, %24 : vector<16x512xf32>
    %27 = arith.addf %25, %26 : vector<16x512xf32>
    %cst_8 = arith.constant dense<0.000000e+00> : vector<512xf32>
    %28 = vector.multi_reduction <add>, %27, %cst_8 [0] : vector<16x512xf32> to vector<512xf32>
    %29 = vector.shape_cast %28 : vector<512xf32> to vector<1x512xf32>
    %c0_9 = arith.constant 0 : index
    %c0_10 = arith.constant 0 : index
    %c0_11 = arith.constant 0 : index
    %30 = vector.load %arg5[%c0_9, %c0_10, %c0_11] : memref<1x1x512xf32, #tpu.memory_space<vmem>>, vector<1x1x512xf32>
    %31 = vector.shape_cast %30 : vector<1x1x512xf32> to vector<1x512xf32>
    %32 = vector.shape_cast %29 : vector<1x512xf32> to vector<1x1x512xf32>
    tpu.vector_store %arg5[%c0_9, %c0_10, %c0_11], %32 {strides = array<i32>} : memref<1x1x512xf32, #tpu.memory_space<vmem>>, vector<1x1x512xf32>,
    return
  }
  func.func @transform_0(%arg0: i32) -> (i32, i32, i32) {
    %c0_i32 = arith.constant 0 : i32
    %c0_i32_0 = arith.constant 0 : i32
    %c0_i32_1 = arith.constant 0 : i32
    return %arg0, %c0_i32, %c0_i32_0 : i32, i32, i32
  }
  func.func @transform_1(%arg0: i32) -> (i32, i32) {
    %c0_i32 = arith.constant 0 : i32
    %c0_i32_0 = arith.constant 0 : i32
    %c0_i32_1 = arith.constant 0 : i32
    return %c0_i32, %c0_i32_0 : i32, i32
  }
  func.func @transform_2(%arg0: i32) -> (i32, i32) {
    %c0_i32 = arith.constant 0 : i32
    %c0_i32_0 = arith.constant 0 : i32
    %c0_i32_1 = arith.constant 0 : i32
    return %c0_i32, %c0_i32_0 : i32, i32
  }
  func.func @transform_3(%arg0: i32) -> (i32, i32) {
    %c0_i32 = arith.constant 0 : i32
    %c0_i32_0 = arith.constant 0 : i32
    %c0_i32_1 = arith.constant 0 : i32
    return %c0_i32, %c0_i32_0 : i32, i32
  }
  func.func @transform_4(%arg0: i32) -> (i32, i32, i32) {
    %c0_i32 = arith.constant 0 : i32
    %c0_i32_0 = arith.constant 0 : i32
    %c0_i32_1 = arith.constant 0 : i32
    return %arg0, %c0_i32, %c0_i32_0 : i32, i32, i32
  }
}

</mosaic_0001>

<bundles_post_ra>
// kernel: tpu_custom_call.1
= control target key start
LH: loop header
LB: loop body
LE: loop exit
PB: predicated region body
PF: predicated region fallthrough
CT: control target
= control target key end

     0   :  { %9 = vsyncpa [#allocation5], 0  ;;  %s3602_s0 = inlined_call_operand.hbm [shape: s32[1,8,512], index: 0, kind: input, shape index: {}]   ;;  %s3603_s1 = inlined_call_operand.vmem [shape: f32[16,1], index: 1, kind: input, shape index: {}]   ;;  %s3604_s2 = inlined_call_operand.vmem [shape: f32[16,16], index: 2, kind: input, shape index: {}]   ;;  %s3605_s3 = inlined_call_operand.hbm [shape: f32[16,16], index: 3, kind: input, shape index: {}]   ;;  %s3606_s4 = inlined_call_operand.hbm [shape: f32[1,1,512], index: 4, kind: output, shape index: {}]  }
   0x1   :  { %10 = vsyncpa [#allocation8], 0 }
   0x2   :  { %11 = vsyncpa [#allocation6], 0  ;;  %s2912_s15 = smov [#allocation4]   ;;  %s2913_s17 = smov [#allocation7]  }
   0x3   :  { %s18_s16 = sshll.u32 %s2912_s15, 4  ;;  %s31_s18 = sshll.u32 %s2913_s17, 4  ;;  %s19_s16 = int_to_ptr.vmem [resolvable:$true] %s18_s16  ;;  %s2946_s18 = int_to_ptr.vmem [resolvable:$true] %s31_s18 }
   0x4   :  { %s2840_s21 = scalar_lea.hbm %s3602_s0, 512 }
   0x5   :  { %p2841_p0 = scmp.ne.s32.totalorder %s3602_s0, %s2840_s21  ;;  %p2844_p1 = scmp.lt.u32.totalorder %s2840_s21, %s3602_s0 }
   0x7   :  { %p2846_p2 = pnand %p2844_p1, %p2841_p0 }
   0x9   :  { %2849 = shalt.err (!%p2846_p2)
}
   0xa   :  { %s2850_s26 = scalar_lea.vmem %s19_s16, 512  ;;  %p2855_p4 = scmp.lt.s32.totalorder %s19_s16, %s19_s16 }
   0xb   :  { %p2851_p3 = scmp.ne.s32.totalorder %s19_s16, %s2850_s26  ;;  %p2856_p5 = scmp.lt.s32.totalorder %s2850_s26, %s2850_s26 }
   0xd   :  { %p2857_p6 = por %p2856_p5, %p2855_p4 }
   0xf   :  { %p2858_p7 = pnand %p2857_p6, %p2851_p3 }
  0x11   :  { %2861 = shalt.err (!%p2858_p7)
}
  0x12   :  { %21 = dma.hbm_to_vmem [thread:$0]  %s3602_s0, 512, %s19_s16, [#allocation5]  }
  0x13   :  { %s2862_s5 = scalar_lea.hbm %s3605_s3, 256 }
  0x14   :  { %p2863_p8 = scmp.ne.s32.totalorder %s3605_s3, %s2862_s5  ;;  %p2866_p9 = scmp.lt.u32.totalorder %s2862_s5, %s3605_s3 }
  0x16   :  { %p2868_p10 = pnand %p2866_p9, %p2863_p8 }
  0x18   :  { %2871 = shalt.err (!%p2868_p10)
}
  0x19   :  { %s2872_s10 = scalar_lea.vmem %s2946_s18, 256  ;;  %p2877_p12 = scmp.lt.s32.totalorder %s2946_s18, %s2946_s18 }
  0x1a   :  { %p2873_p11 = scmp.ne.s32.totalorder %s2946_s18, %s2872_s10  ;;  %p2878_p13 = scmp.lt.s32.totalorder %s2872_s10, %s2872_s10 }
  0x1c   :  { %p2879_p0 = por %p2878_p13, %p2877_p12 }
  0x1e   :  { %p2880_p1 = pnand %p2879_p0, %p2873_p11 }
  0x20   :  { %2883 = shalt.err (!%p2880_p1)
}
  0x21   :  { %s2914_s0 = smov 128   ;;  %s2915_s11 = smov 8  }
  0x22   :  { %37 = dma.hbm_to_vmem [thread:$0]  %s3605_s3, 256, %s2946_s18, [#allocation8], %s2914_s0, %s2914_s0, %s2915_s11  }
  0x23   :  { %2906 = dma.done.wait [#allocation5], 512  }
  0x24   :  { %2907 = vsyncadd [#allocation5], 4294966784 }
  0x25   :  { %2908 = dma.done.wait [#allocation8], 256  }
  0x26   :  { %2909 = vsyncadd [#allocation8], 4294967040  ;;  %vm82_vm0 = vcmask 130048   ;;  %v2980_v0 = vld [vmem:[%s3604_s2] sm:$0xff]  ;;  %v2985_v1 = vld [vmem:[%s3604_s2 + $0x8] sm:$0xff]  ;;  %v2916_v8 = vmov 0   ;;  %v157_v56 = vlaneseq }
  0x27   :  { %v2987_v2 = vld [vmem:[#allocation7] sm:$0xff]  ;;  %v83_v3 = vsel %vm82_vm0, %v2980_v0, -inf  ;;  %v2993_v5 = vld [vmem:[#allocation7 + $0x8] sm:$0xff]  ;;  %v86_v6 = vsel %vm82_vm0, %v2985_v1, -inf  ;;  %2817 = vset.pattern.permute.xlu1 %v2916_v8  ;;  %2816 = vset.pattern.permute.xlu0 %v2916_v8  ;;  %vm50_vm1 = vcmask 7168   ;;  %v2917_v58 = vmov 0.0  }
  0x28   :  { %v125_v4 = vsel %vm82_vm0, %v2987_v2, -inf  ;;  %84 = vmax.xlane.f32.xlu0 %v83_v3  ;;  %v128_v7 = vsel %vm82_vm0, %v2993_v5, -inf  ;;  %v48_v9 = vld [vmem:[%s3603_s1] sm:$0xff]  ;;  %v49_v10 = vld [vmem:[%s3603_s1 + $0x8] sm:$0xff]  ;;  %v3028_v57 = vshrl.u32 %v157_v56, 7  ;;  %357 = vmatprep.mubr.f32.mxu0 %v2917_v58  ;;  %v3034_v60 = vld [vmem:[#allocation4 + $0x18] sm:$0xff] }
  0x29   :  { %126 = vmax.xlane.f32.xlu1 %v125_v4  ;;  %v51_v11 = vsel %vm50_vm1, %v48_v9, -inf  ;;  %v52_v12 = vsel %vm50_vm1, %v49_v10, -inf  ;;  %897 = vmatprep.mubr.f32.mxu1 %v2917_v58  ;;  %v3032_v59 = vld [vmem:[#allocation4 + $0x8] sm:$0xff]  ;;  %v3040_v63 = vld [vmem:[#allocation4] sm:$0xff]  ;;  %v3042_v3 = vld [vmem:[#allocation4 + $0x10] sm:$0xff]  ;;  %s2920_s1 = smov [#allocation9]  }
  0x2a   :  { %v53_v13 = vmax.f32 %v51_v11, %v52_v12  ;;  %v3037_v61 = vadd.s32 8, %v3028_v57  ;;  %v202_v62 = vsub.s32 1, %v3028_v57  ;;  %s2549_s20 = sshll.u32 %s2920_s1, 4  ;;  %s2550_s20 = int_to_ptr.vmem [resolvable:$true] %s2549_s20 }
  0x2b   :  { %s2884_s21 = scalar_lea.vmem %s2550_s20, 64  ;;  %p2889_p3 = scmp.lt.s32.totalorder %s2550_s20, %s2550_s20 }
  0x2c   :  { %87 = vmax.xlane.f32.xlu0 %v86_v6  ;;  %v54_v14 = vrot.slane %v53_v13, 4  ;;  %v207_v4 = vrot.slane %v3032_v59, %v202_v62  ;;  %v215_v6 = vrot.slane %v3034_v60, %v202_v62  ;;  %v3050_v8 = vrot.slane %v3042_v3, %v202_v62  ;;  %p2885_p2 = scmp.ne.s32.totalorder %s2550_s20, %s2884_s21  ;;  %p2890_p4 = scmp.lt.s32.totalorder %s2884_s21, %s2884_s21 }
  0x2d   :  { %129 = vmax.xlane.f32.xlu1 %v128_v7  ;;  %v3047_v7 = vrot.slane %v3040_v63, %v202_v62 }
  0x2e   :  { %v55_v15 = vmax.f32 %v53_v13, %v54_v14  ;;  %vm217_vm2 = vcmp.eq.s32.totalorder %v207_v4, %v3028_v57  ;;  %vm221_vm3 = vcmp.eq.s32.totalorder %v207_v4, %v3037_v61  ;;  %vm219_vm4 = vcmp.eq.s32.totalorder %v215_v6, %v3028_v57  ;;  %p2891_p5 = por %p2890_p4, %p2889_p3 }
  0x2f   :  { %vm223_vm5 = vcmp.eq.s32.totalorder %v215_v6, %v3037_v61  ;;  %vm3062_vm6 = vmpackc.low %vm221_vm3, %vm217_vm2  ;;  %v3067_v12 = vsel %vm219_vm4, 1.0, %v2917_v58  ;;  %vm216_vm8 = vcmp.eq.s32.totalorder %v3047_v7, %v3028_v57  ;;  %vm220_vm9 = vcmp.eq.s32.totalorder %v3047_v7, %v3037_v61 }
  0x30   :  { %v56_v16 = vrot.slane %v55_v15, 2  ;;  %v3070_v13 = vsel %vm223_vm5, 1.0, %v2917_v58  ;;  %vm3083_vm7 = vmpackc.low %vm223_vm5, %vm219_vm4  ;;  %vm218_vm11 = vcmp.eq.s32.totalorder %v3050_v8, %v3028_v57  ;;  %vm222_vm12 = vcmp.eq.s32.totalorder %v3050_v8, %v3037_v61  ;;  %p2892_p6 = pnand %p2891_p5, %p2885_p2 }
  0x31   :  { %vm3108_vm10 = vmpackc.low %vm220_vm9, %vm216_vm8  ;;  %v3156_v4 = vsel %vm216_vm8, 1.0, %v2917_v58  ;;  %v3162_v6 = vsel %vm220_vm9, 1.0, %v2917_v58 }
  0x32   :  { %v57_v17 = vmax.f32 %v55_v15, %v56_v16  ;;  %v2918_v15 = vmov 1.0|1.0   ;;  %vm3126_vm13 = vmpackc.low %vm222_vm12, %vm218_vm11  ;;  %v3185_v7 = vsub.f32 %v3162_v6, %v3162_v6 }
  0x33   :  { %2632 = vmatprep.subr.msk.bf16.mxu0 %vm3062_vm6, %v2918_v15  ;;  %2656 = vmatprep.subr.msk.bf16.mxu1 %vm3083_vm7, %v2918_v15 }
  0x34   :  { %v58_v18 = vrot.slane %v57_v17, 1  ;;  %2634 = vmatpush1.bf16.msk.msra.mxu0 %vm3108_vm10, %v2918_v15  ;;  %2658 = vmatpush1.bf16.msk.msra.mxu1 %vm3126_vm13, %v2918_v15 }
  0x36   :  { %v59_v19 = vmax.f32 %v57_v17, %v58_v18 }
  0x38   :  { %v60_v20 = vsub.f32 %v48_v9, %v59_v19  ;;  %v61_v21 = vsub.f32 %v49_v10, %v59_v19 }
  0x3a   :  { %v62_v22 = vmul.f32 1.442695, %v60_v20  ;;  %v64_v23 = vmul.f32 1.442695, %v61_v21  ;;  %v3093_v20 = vsub.f32 %v3070_v13, %v3070_v13 }
  0x3c   :  { %2818 = vpow2.f32 %v62_v22 }
  0x3d   :  { %2820 = vpow2.f32 %v64_v23 }
  0x46   :  { %v2819_v24 = vpop.eup %2818 }
  0x47   :  { %v2821_v25 = vpop.eup %2820  ;;  %v66_v26 = vsel %vm50_vm1, %v2819_v24, 0.0 }
  0x48   :  { %v67_v27 = vsel %vm50_vm1, %v2821_v25, 0.0 }
  0x49   :  { %v68_v28 = vadd.f32 %v67_v27, %v66_v26 }
  0x4b   :  { %v69_v29 = vrot.slane %v68_v28, 4 }
  0x4d   :  { %v70_v30 = vadd.f32 %v69_v29, %v68_v28  ;;  %v934_v28 = vand.u32 4294901760, %v3093_v20 }
  0x4f   :  { %v71_v31 = vrot.slane %v70_v30, 2 }
  0x51   :  { %v72_v34 = vadd.f32 %v71_v31, %v70_v30 }
  0x53   :  { %v73_v38 = vrot.slane %v72_v34, 1 }
  0x55   :  { %v74_v40 = vadd.f32 %v73_v38, %v72_v34 }
  0xb5   :  { %v3009_v32 = vpop.xlane.xlu0 %84 }
  0xb6   :  { %v89_v33 = vsub.f32 %v2980_v0, %v3009_v32  ;;  %v3019_v50 = vpop.xlane.xlu1 %126 }
  0xb7   :  { %v131_v53 = vsub.f32 %v2987_v2, %v3019_v50 }
  0xb8   :  { %v91_v35 = vmul.f32 1.442695, %v89_v33  ;;  %v935_v33 = vsub.f32 %v3093_v20, %v934_v28 }
  0xb9   :  { %v3013_v36 = vpop.xlane.xlu0 %87  ;;  %v133_v55 = vmul.f32 1.442695, %v131_v53 }
  0xba   :  { %2822 = vpow2.f32 %v91_v35  ;;  %v90_v37 = vsub.f32 %v2985_v1, %v3013_v36  ;;  %v3021_v51 = vpop.xlane.xlu1 %129 }
  0xbb   :  { %v132_v52 = vsub.f32 %v2993_v5, %v3021_v51 }
  0xbc   :  { %v93_v39 = vmul.f32 1.442695, %v90_v37 }
  0xbd   :  { %v135_v54 = vmul.f32 1.442695, %v132_v52 }
  0xbe   :  { %2824 = vpow2.f32 %v93_v39  ;;  %v936_v39 = vand.u32 4294901760, %v935_v33 }
  0xbf   :  { %2826 = vlog2.f32 %v74_v40 }
  0xc0   :  { %2828 = vpow2.f32 %v135_v54 }
  0xc1   :  { %2830 = vpow2.f32 %v133_v55 }
  0xc4   :  { %v2823_v41 = vpop.eup %2822 }
  0xc5   :  { %v95_v42 = vsel %vm82_vm0, %v2823_v41, 0.0 }
  0xc6   :  { %96 = vadd.xlane.f32.xlu0 %v95_v42 }
  0xc8   :  { %v2825_v43 = vpop.eup %2824 }
  0xc9   :  { %v98_v44 = vsel %vm82_vm0, %v2825_v43, 0.0  ;;  %v2827_v45 = vpop.eup %2826 }
  0xca   :  { %99 = vadd.xlane.f32.xlu1 %v98_v44  ;;  %v76_v46 = vmul.f32 0.6931472, %v2827_v45  ;;  %v2829_v14 = vpop.eup %2828 }
  0xcb   :  { %v140_v22 = vsel %vm82_vm0, %v2829_v14, 0.0  ;;  %v2831_v24 = vpop.eup %2830 }
  0xcc   :  { %v77_v47 = vadd.f32 %v76_v46, %v59_v19  ;;  %v3089_v19 = vsub.f32 %v3067_v12, %v3067_v12  ;;  %v137_v34 = vsel %vm82_vm0, %v2831_v24, 0.0 }
  0xce   :  { %v79_v48 = vsub.f32 %v49_v10, %v77_v47  ;;  %v78_v49 = vsub.f32 %v48_v9, %v77_v47  ;;  %v3057_v9 = vsel %vm217_vm2, 1.0, %v2917_v58  ;;  %v3060_v10 = vsel %vm221_vm3, 1.0, %v2917_v58 }
  0xcf   :  { %v3077_v16 = vsub.f32 %v3057_v9, %v3057_v9  ;;  %v3081_v17 = vsub.f32 %v3060_v10, %v3060_v10  ;;  %v922_v27 = vand.u32 4294901760, %v3089_v19  ;;  %v2663_v43 = vpack.c.bf16 %v3093_v20, %v3089_v19 }
  0xd1   :  { %v382_v25 = vand.u32 4294901760, %v3077_v16  ;;  %v394_v26 = vand.u32 4294901760, %v3081_v17  ;;  %v923_v31 = vsub.f32 %v3089_v19, %v922_v27  ;;  %v2639_v42 = vpack.c.bf16 %v3081_v17, %v3077_v16 }
  0xd2   :  { %v3148_v45 = vpack.c.bf16 %v934_v28, %v922_v27  ;;  %v400_v28 = vand.u32 4294901760, %v3185_v7 }
  0xd3   :  { %v383_v29 = vsub.f32 %v3077_v16, %v382_v25  ;;  %v395_v30 = vsub.f32 %v3081_v17, %v394_v26  ;;  %v924_v38 = vand.u32 4294901760, %v923_v31  ;;  %v3146_v44 = vpack.c.bf16 %v394_v26, %v382_v25 }
  0xd4   :  { %v242_v16 = vsub.s32 2, %v3028_v57 }
  0xd5   :  { %v384_v35 = vand.u32 4294901760, %v383_v29  ;;  %v396_v37 = vand.u32 4294901760, %v395_v30  ;;  %v2659_v41 = vpack.c.bf16 %v936_v39, %v924_v38 }
  0xd6   :  { %v3254_v17 = vrot.slane %v3032_v59, %v242_v16  ;;  %v3259_v19 = vrot.slane %v3034_v60, %v242_v16 }
  0xd7   :  { %v2635_v40 = vpack.c.bf16 %v396_v37, %v384_v35  ;;  %2660 = vmatprep.subr.bf16.mxu1 %v2659_v41 }
  0xd8   :  { %vm257_vm14 = vcmp.eq.s32.totalorder %v3254_v17, %v3028_v57  ;;  %vm261_vm15 = vcmp.eq.s32.totalorder %v3254_v17, %v3037_v61  ;;  %vm259_vm1 = vcmp.eq.s32.totalorder %v3259_v19, %v3028_v57  ;;  %vm263_vm2 = vcmp.eq.s32.totalorder %v3259_v19, %v3037_v61 }
  0xd9   :  { %2636 = vmatprep.subr.bf16.mxu0 %v2635_v40  ;;  %vm3379_vm8 = vmpackc.low %vm263_vm2, %vm259_vm1 }
  0xdb   :  { %116 = vperm.xlu1 %2817, %v79_v48  }
  0xdc   :  { %111 = vperm.xlu0 %2816, %v78_v49  }
  0xfb   :  { %141 = vadd.xlane.f32.xlu0 %v140_v22  ;;  %v3175_v22 = vsel %vm222_vm12, 1.0, %v2917_v58 }
  0xfc   :  { %v3193_v8 = vsub.f32 %v3175_v22, %v3175_v22 }
  0xfe   :  { %v940_v30 = vand.u32 4294901760, %v3193_v8 }
  0xff   :  { %138 = vadd.xlane.f32.xlu1 %v137_v34  ;;  %v401_v34 = vsub.f32 %v3185_v7, %v400_v28 }
 0x100   :  { %v941_v38 = vsub.f32 %v3193_v8, %v940_v30 }
 0x153   :  { %v97_v46 = vpop.xlane.xlu0 %96 }
 0x154   :  { %2832 = vlog2.f32 %v97_v46 }
 0x157   :  { %v100_v47 = vpop.xlane.xlu1 %99 }
 0x158   :  { %2834 = vlog2.f32 %v100_v47 }
 0x15b   :  { %v112_v54 = vpop.permute.xlu0 %111  ;;  %v117_v25 = vpop.permute.xlu1 %116 }
 0x15e   :  { %v2833_v48 = vpop.eup %2832 }
 0x15f   :  { %v102_v49 = vmul.f32 0.6931472, %v2833_v48  ;;  %v402_v48 = vand.u32 4294901760, %v401_v34 }
 0x161   :  { %v105_v52 = vadd.f32 %v102_v49, %v3009_v32 }
 0x162   :  { %v2835_v53 = vpop.eup %2834 }
 0x163   :  { %v104_v55 = vmul.f32 0.6931472, %v2835_v53  ;;  %v107_v62 = vsub.f32 %v2980_v0, %v105_v52  ;;  %v3169_v0 = vsel %vm218_vm11, 1.0, %v2917_v58 }
 0x164   :  { %v3189_v26 = vsub.f32 %v3169_v0, %v3169_v0 }
 0x165   :  { %v106_v14 = vadd.f32 %v104_v55, %v3013_v36  ;;  %v119_v32 = vadd.f32 %v112_v54, %v107_v62  ;;  %v3181_v36 = vsub.f32 %v3156_v4, %v3156_v4  ;;  %v942_v54 = vand.u32 4294901760, %v941_v38 }
 0x166   :  { %v928_v29 = vand.u32 4294901760, %v3189_v26  ;;  %v2665_v34 = vpack.c.bf16 %v3193_v8, %v3189_v26 }
 0x167   :  { %v108_v24 = vsub.f32 %v2985_v1, %v106_v14  ;;  %121 = vst.msk [vmem:[#allocation2] sm:$0xff] %vm82_vm0, %v119_v32  ;;  %v388_v27 = vand.u32 4294901760, %v3181_v36 }
 0x168   :  { %v929_v37 = vsub.f32 %v3189_v26, %v928_v29  ;;  %v2673_v38 = vpack.c.bf16 %v940_v30, %v928_v29 }
 0x169   :  { %v120_v1 = vadd.f32 %v117_v25, %v108_v24  ;;  %v389_v33 = vsub.f32 %v3181_v36, %v388_v27 }
 0x16a   :  { %v930_v53 = vand.u32 4294901760, %v929_v37  ;;  %v2578_v37 = vsel %vm259_vm1, 1.0, %v2917_v58 }
 0x16b   :  { %122 = vst.msk [vmem:[#allocation2 + $0x8] sm:$0xff] %vm82_vm0, %v120_v1  ;;  %v390_v47 = vand.u32 4294901760, %v389_v33  ;;  %v2641_v33 = vpack.c.bf16 %v3185_v7, %v3181_v36  ;;  %v251_v7 = vrot.slane %v3042_v3, %v242_v16 }
 0x16c   :  { %v2661_v25 = vpack.c.bf16 %v942_v54, %v930_v53 }
 0x16d   :  { %v2637_v24 = vpack.c.bf16 %v402_v48, %v390_v47  ;;  %v3312_v47 = vsub.f32 %v2578_v37, %v2578_v37  ;;  %vm258_vm5 = vcmp.eq.s32.totalorder %v251_v7, %v3028_v57 }
 0x16e   :  { %v280_v31 = vld [vmem:[#allocation2] sm:$0xff] }
 0x16f   :  { %v284_v35 = vsel %vm82_vm0, %v280_v31, 0 }
 0x170   :  { %v3213_v39 = vand.u32 4294901760, %v284_v35 }
 0x172   :  { %v359_v40 = vsub.f32 %v284_v35, %v3213_v39  ;;  %v281_v41 = vld [vmem:[#allocation2 + $0x8] sm:$0xff]  ;;  %v2580_v35 = vsel %vm261_vm15, 1.0, %v2917_v58 }
 0x173   :  { %v287_v46 = vsel %vm82_vm0, %v281_v41, 0 }
 0x174   :  { %v3217_v49 = vand.u32 4294901760, %v359_v40  ;;  %v3219_v52 = vand.u32 4294901760, %v287_v46 }
 0x176   :  { %v361_v55 = vsub.f32 %v359_v40, %v3217_v49  ;;  %v370_v62 = vsub.f32 %v287_v46, %v3219_v52  ;;  %v3310_v46 = vsub.f32 %v2580_v35, %v2580_v35 }
 0x178   :  { %v362_v14 = vand.u32 4294901760, %v361_v55  ;;  %v3223_v32 = vand.u32 4294901760, %v370_v62 }
 0x17a   :  { %363 = vmatmul.mubr.f32.vlgmr.msra.gmra.mrb[0].mxu0 %v362_v14  ;;  %903 = vmatmul.mubr.f32.vlgmr.msra.gmra.mrb[0].mxu1 %v362_v14  ;;  %v372_v1 = vsub.f32 %v370_v62, %v3223_v32 }
 0x17b   :  { %368 = vmatprep.mubr.f32.mxu0 %v2917_v58  ;;  %908 = vmatprep.mubr.f32.mxu1 %v2917_v58 }
 0x17c   :  { %v373_v31 = vand.u32 4294901760, %v372_v1  ;;  %2638 = vmatpush1.bf16.msra.mxu0 %v2637_v24  ;;  %2662 = vmatpush1.bf16.msra.mxu1 %v2661_v25  ;;  %v2577_v24 = vsel %vm258_vm5, 1.0, %v2917_v58 }
 0x17d   :  { %2640 = vmatprep.subr.bf16.mxu0 %v2639_v42  ;;  %2664 = vmatprep.subr.bf16.mxu1 %v2663_v43  ;;  %v2576_v43 = vsel %vm257_vm14, 1.0, %v2917_v58  ;;  %v3415_v23 = vsub.f32 %v2577_v24, %v2577_v24 }
 0x17e   :  { %374 = vmatmul.mubr.f32.gmra.mrb[2].mxu0 %v373_v31  ;;  %914 = vmatmul.mubr.f32.gmra.mrb[2].mxu1 %v373_v31  ;;  %v3308_v41 = vsub.f32 %v2576_v43, %v2576_v43 }
 0x17f   :  { %464 = vmatprep.mubr.f32.mxu0 %v2917_v58  ;;  %1004 = vmatprep.mubr.f32.mxu1 %v2917_v58 }
 0x180   :  { %v1470_v8 = vand.u32 4294901760, %v3308_v41 }
 0x182   :  { %466 = vmatmul.mubr.f32.vlgmr.msra.gmra.mrb[0].mxu0 %v3213_v39  ;;  %1006 = vmatmul.mubr.f32.vlgmr.msra.gmra.mrb[0].mxu1 %v3213_v39 }
 0x183   :  { %471 = vmatprep.mubr.f32.mxu0 %v2917_v58  ;;  %1011 = vmatprep.mubr.f32.mxu1 %v2917_v58 }
 0x184   :  { %2642 = vmatpush1.bf16.msra.mxu0 %v2641_v33  ;;  %2666 = vmatpush1.bf16.msra.mxu1 %v2665_v34 }
 0x185   :  { %2644 = vmatprep.subr.msk.bf16.mxu0 %vm3062_vm6, %v2918_v15  ;;  %2668 = vmatprep.subr.msk.bf16.mxu1 %vm3083_vm7, %v2918_v15 }
 0x186   :  { %473 = vmatmul.mubr.f32.gmra.mrb[2].mxu0 %v3219_v52  ;;  %1013 = vmatmul.mubr.f32.gmra.mrb[2].mxu1 %v3219_v52 }
 0x187   :  { %551 = vmatprep.mubr.f32.mxu0 %v2917_v58  ;;  %1091 = vmatprep.mubr.f32.mxu1 %v2917_v58 }
 0x188   :  { %v142_v20 = vpop.xlane.xlu0 %141 }
 0x189   :  { %2836 = vlog2.f32 %v142_v20 }
 0x18a   :  { %554 = vmatmul.mubr.f32.vlgmr.msra.gmra.mrb[0].mxu0 %v359_v40  ;;  %1094 = vmatmul.mubr.f32.vlgmr.msra.gmra.mrb[0].mxu1 %v359_v40  ;;  %v3306_v40 = vrot.slane %v3040_v63, %v242_v16 }
 0x18b   :  { %559 = vmatprep.mubr.f32.mxu0 %v2917_v58  ;;  %1099 = vmatprep.mubr.f32.mxu1 %v2917_v58 }
 0x18c   :  { %v139_v42 = vpop.xlane.xlu1 %138  ;;  %2646 = vmatpush1.bf16.msk.msra.mxu0 %vm3108_vm10, %v2918_v15  ;;  %2670 = vmatpush1.bf16.msk.msra.mxu1 %vm3126_vm13, %v2918_v15  ;;  %vm256_vm3 = vcmp.eq.s32.totalorder %v3306_v40, %v3028_v57  ;;  %vm260_vm4 = vcmp.eq.s32.totalorder %v3306_v40, %v3037_v61 }
 0x18d   :  { %2838 = vlog2.f32 %v139_v42  ;;  %2648 = vmatprep.subr.bf16.mxu0 %v3146_v44  ;;  %2672 = vmatprep.subr.bf16.mxu1 %v3148_v45  ;;  %v2582_v44 = vsel %vm263_vm2, 1.0, %v2917_v58  ;;  %v2649_v45 = vpack.c.bf16 %v400_v28, %v388_v27  ;;  %v1482_v27 = vand.u32 4294901760, %v3310_v46  ;;  %vm3427_vm9 = vmpackc.low %vm260_vm4, %vm256_vm3 }
 0x18e   :  { %562 = vmatmul.mubr.f32.gmra.mrb[2].mxu0 %v370_v62  ;;  %1102 = vmatmul.mubr.f32.gmra.mrb[2].mxu1 %v370_v62  ;;  %v3314_v48 = vsub.f32 %v2582_v44, %v2582_v44  ;;  %v2010_v28 = vand.u32 4294901760, %v3312_v47 }
 0x18f   :  { %636 = vmatprep.mubr.f32.mxu0 %v2917_v58  ;;  %1176 = vmatprep.mubr.f32.mxu1 %v2917_v58  ;;  %v1483_v54 = vsub.f32 %v3310_v46, %v1482_v27 }
 0x190   :  { %v2022_v29 = vand.u32 4294901760, %v3314_v48  ;;  %v2011_v55 = vsub.f32 %v3312_v47, %v2010_v28 }
 0x192   :  { %640 = vmatmul.mubr.f32.vlgmr.msra.gmra.mrb[0].mxu0 %v3217_v49  ;;  %1180 = vmatmul.mubr.f32.vlgmr.msra.gmra.mrb[0].mxu1 %v3217_v49  ;;  %v2023_v62 = vsub.f32 %v3314_v48, %v2022_v29  ;;  %v2012_v34 = vand.u32 4294901760, %v2011_v55 }
 0x193   :  { %v2837_v36 = vpop.eup %2836  ;;  %645 = vmatprep.mubr.f32.mxu0 %v2917_v58  ;;  %1185 = vmatprep.mubr.f32.mxu1 %v2917_v58 }
 0x194   :  { %v146_v26 = vmul.f32 0.6931472, %v2837_v36  ;;  %2650 = vmatpush1.bf16.msra.mxu0 %v2649_v45  ;;  %2674 = vmatpush1.bf16.msra.mxu1 %v2673_v38  ;;  %v2024_v16 = vand.u32 4294901760, %v2023_v62  ;;  %v2016_v45 = vand.u32 4294901760, %v3415_v23 }
 0x195   :  { %2652 = vmatprep.subr.msk.bf16.mxu0 %vm3062_vm6, %v2918_v15  ;;  %2676 = vmatprep.subr.msk.bf16.mxu1 %vm3083_vm7, %v2918_v15  ;;  %vm262_vm6 = vcmp.eq.s32.totalorder %v251_v7, %v3037_v61  ;;  %vm3353_vm7 = vmpackc.low %vm261_vm15, %vm257_vm14 }
 0x196   :  { %v148_v30 = vadd.f32 %v146_v26, %v3021_v51  ;;  %649 = vmatmul.mubr.f32.gmra.mrb[2].mxu0 %v3223_v32  ;;  %1189 = vmatmul.mubr.f32.gmra.mrb[2].mxu1 %v3223_v32  ;;  %v2575_v51 = vsel %vm256_vm3, 1.0, %v2917_v58  ;;  %v2581_v25 = vsel %vm262_vm6, 1.0, %v2917_v58  ;;  %v2707_v43 = vpack.c.bf16 %v2024_v16, %v2012_v34 }
 0x197   :  { %v2839_v11 = vpop.eup %2838  ;;  %731 = vmatprep.mubr.f32.mxu0 %v2917_v58  ;;  %1271 = vmatprep.mubr.f32.mxu1 %v2917_v58  ;;  %v3402_v31 = vsub.f32 %v2575_v51, %v2575_v51  ;;  %v3417_v17 = vsub.f32 %v2581_v25, %v2581_v25  ;;  %v2687_v34 = vpack.c.bf16 %v3310_v46, %v3308_v41  ;;  %v162_v32 = vsub.s32 0, %v3028_v57 }
 0x198   :  { %v150_v18 = vsub.f32 %v2993_v5, %v148_v30  ;;  %v144_v49 = vmul.f32 0.6931472, %v2839_v11  ;;  %v1471_v5 = vsub.f32 %v3308_v41, %v1470_v8  ;;  %v2017_v11 = vsub.f32 %v3415_v23, %v2016_v45 }
 0x199   :  { %v1476_v35 = vand.u32 4294901760, %v3402_v31  ;;  %v2028_v38 = vand.u32 4294901760, %v3417_v17  ;;  %v2711_v16 = vpack.c.bf16 %v3314_v48, %v3312_v47  ;;  %vm2540_vm3 = vcmp.lt.s32.totalorder %v157_v56, 512 }
 0x19a   :  { %152 = vst.msk [vmem:[#allocation3 + $0x8] sm:$0xff] %vm82_vm0, %v150_v18  ;;  %v147_v14 = vadd.f32 %v144_v49, %v3019_v50  ;;  %733 = vmatmul.mubr.f32.vlgmr.msra.gmra.mrb[0].mxu0 %v3213_v39  ;;  %1273 = vmatmul.mubr.f32.vlgmr.msra.gmra.mrb[0].mxu1 %v3213_v39  ;;  %v2579_v50 = vsel %vm260_vm4, 1.0, %v2917_v58  ;;  %v1472_v33 = vand.u32 4294901760, %v1471_v5  ;;  %v2018_v55 = vand.u32 4294901760, %v2017_v11 }
 0x19b   :  { %738 = vmatprep.mubr.f32.mxu0 %v2917_v58  ;;  %1278 = vmatprep.mubr.f32.mxu1 %v2917_v58  ;;  %v3413_v21 = vsub.f32 %v2579_v50, %v2579_v50  ;;  %v1477_v7 = vsub.f32 %v3402_v31, %v1476_v35  ;;  %v2029_v18 = vsub.f32 %v3417_v17, %v2028_v38 }
 0x19c   :  { %v149_v1 = vsub.f32 %v2987_v2, %v147_v14  ;;  %2654 = vmatpush1.bf16.msk.msra.mxu0 %vm3108_vm10, %v2918_v15  ;;  %2678 = vmatpush1.bf16.msk.msra.mxu1 %vm3126_vm13, %v2918_v15  ;;  %v1484_v2 = vand.u32 4294901760, %v1483_v54  ;;  %vm3435_vm10 = vmpackc.low %vm262_vm6, %vm258_vm5  ;;  %v2721_v46 = vpack.c.bf16 %v2028_v38, %v2016_v45 }
 0x19d   :  { %2680 = vmatprep.subr.msk.bf16.mxu0 %vm3353_vm7, %v2918_v15  ;;  %2704 = vmatprep.subr.msk.bf16.mxu1 %vm3379_vm8, %v2918_v15  ;;  %v1488_v44 = vand.u32 4294901760, %v3413_v21  ;;  %v1478_v5 = vand.u32 4294901760, %v1477_v7  ;;  %v2030_v62 = vand.u32 4294901760, %v2029_v18 }
 0x19e   :  { %151 = vst.msk [vmem:[#allocation3] sm:$0xff] %vm82_vm0, %v149_v1  ;;  %740 = vmatmul.mubr.f32.gmra.mrb[2].mxu0 %v3219_v52  ;;  %1280 = vmatmul.mubr.f32.gmra.mrb[2].mxu1 %v3219_v52  ;;  %v2683_v42 = vpack.c.bf16 %v1484_v2, %v1472_v33 }
 0x19f   :  { %814 = vmatprep.mubr.f32.mxu0 %v2917_v58  ;;  %1354 = vmatprep.mubr.f32.mxu1 %v2917_v58  ;;  %v1489_v30 = vsub.f32 %v3413_v21, %v1488_v44  ;;  %v2709_v1 = vpack.c.bf16 %v2030_v62, %v2018_v55  ;;  %v2697_v41 = vpack.c.bf16 %v1488_v44, %v1476_v35 }
 0x1a1   :  { %v1370_v37 = vld [vmem:[#allocation3 + $0x8] sm:$0xff]  ;;  %v1490_v54 = vand.u32 4294901760, %v1489_v30 }
 0x1a2   :  { %816 = vmatmul.mubr.f32.vlgmr.msra.gmra.mrb[0].mxu0 %v3213_v39  ;;  %1356 = vmatmul.mubr.f32.vlgmr.msra.gmra.mrb[0].mxu1 %v3213_v39  ;;  %v1375_v40 = vsel %vm82_vm0, %v1370_v37, 0  ;;  %v2713_v37 = vpack.c.bf16 %v3417_v17, %v3415_v23  ;;  %v167_v23 = vrot.slane %v3032_v59, %v162_v32  ;;  %v175_v17 = vrot.slane %v3034_v60, %v162_v32 }
 0x1a3   :  { %821 = vmatprep.mubr.f32.mxu0 %v2917_v58  ;;  %1361 = vmatprep.mubr.f32.mxu1 %v2917_v58  ;;  %v3448_v36 = vand.u32 4294901760, %v1375_v40  ;;  %v2685_v25 = vpack.c.bf16 %v1490_v54, %v1478_v5 }
 0x1a4   :  { %2682 = vmatpush1.bf16.msk.msra.mxu0 %vm3427_vm9, %v2918_v15  ;;  %2706 = vmatpush1.bf16.msk.msra.mxu1 %vm3435_vm10, %v2918_v15  ;;  %vm177_vm12 = vcmp.eq.s32.totalorder %v167_v23, %v3028_v57  ;;  %vm179_vm13 = vcmp.eq.s32.totalorder %v175_v17, %v3028_v57  ;;  %vm181_vm1 = vcmp.eq.s32.totalorder %v167_v23, %v3037_v61 }
 0x1a5   :  { %2684 = vmatprep.subr.bf16.mxu0 %v2683_v42  ;;  %2708 = vmatprep.subr.bf16.mxu1 %v2707_v43  ;;  %v1369_v39 = vld [vmem:[#allocation3] sm:$0xff]  ;;  %v2689_v43 = vpack.c.bf16 %v3413_v21, %v3402_v31  ;;  %v163_v31 = vrot.slane %v3040_v63, %v162_v32  ;;  %v171_v21 = vrot.slane %v3042_v3, %v162_v32  ;;  %v2560_v59 = vsel %vm177_vm12, 1.0, %v2917_v58 }
 0x1a6   :  { %823 = vmatmul.mubr.f32.gmra.mrb[2].mxu0 %v3219_v52  ;;  %1363 = vmatmul.mubr.f32.gmra.mrb[2].mxu1 %v3219_v52  ;;  %v1372_v26 = vsel %vm82_vm0, %v1369_v39, 0  ;;  %v1458_v52 = vsub.f32 %v1375_v40, %v3448_v36  ;;  %v2695_v40 = vpack.c.bf16 %v1482_v27, %v1470_v8  ;;  %v2719_v39 = vpack.c.bf16 %v2022_v29, %v2010_v28 }
 0x1a7   :  { %1445 = vmatprep.mubr.f32.mxu0 %v2917_v58  ;;  %1985 = vmatprep.mubr.f32.mxu1 %v2917_v58  ;;  %v3473_v49 = vand.u32 4294901760, %v1372_v26  ;;  %vm176_vm0 = vcmp.eq.s32.totalorder %v163_v31, %v3028_v57  ;;  %vm178_vm11 = vcmp.eq.s32.totalorder %v171_v21, %v3028_v57  ;;  %vm180_vm14 = vcmp.eq.s32.totalorder %v163_v31, %v3037_v61 }
 0x1a8   :  { %v1459_v50 = vand.u32 4294901760, %v1458_v52  ;;  %vm182_vm15 = vcmp.eq.s32.totalorder %v171_v21, %v3037_v61  ;;  %v2559_v63 = vsel %vm176_vm0, 1.0, %v2917_v58  ;;  %v2561_v3 = vsel %vm178_vm11, 1.0, %v2917_v58 }
 0x1a9   :  { %v1447_v51 = vsub.f32 %v1372_v26, %v3473_v49  ;;  %v2562_v60 = vsel %vm179_vm13, 1.0, %v2917_v58  ;;  %v2563_v19 = vsel %vm180_vm14, 1.0, %v2917_v58  ;;  %v2565_v20 = vsel %vm182_vm15, 1.0, %v2917_v58 }
 0x1aa   :  { %v1460_v2 = vsub.f32 %v1458_v52, %v1459_v50  ;;  %vm183_vm2 = vcmp.eq.s32.totalorder %v175_v17, %v3037_v61 }
 0x1ab   :  { %v1448_v14 = vand.u32 4294901760, %v1447_v51  ;;  %v2566_v61 = vsel %vm183_vm2, 1.0, %v2917_v58 }
 0x1ac   :  { %v1461_v42 = vand.u32 4294901760, %v1460_v2 }
 0x1ad   :  { %v1449_v24 = vsub.f32 %v1447_v51, %v1448_v14 }
 0x1af   :  { %v1450_v33 = vand.u32 4294901760, %v1449_v24 }
 0x1b1   :  { %1451 = vmatmul.mubr.f32.vlgmr.msra.gmra.mrb[4].mxu0 %v1450_v33  ;;  %1991 = vmatmul.mubr.f32.vlgmr.msra.gmra.mrb[4].mxu1 %v1450_v33 }
 0x1b2   :  { %2686 = vmatpush1.bf16.msra.mxu0 %v2685_v25  ;;  %2710 = vmatpush1.bf16.msra.mxu1 %v2709_v1 }
 0x1b3   :  { %1456 = vmatprep.mubr.f32.mxu0 %v2917_v58  ;;  %1996 = vmatprep.mubr.f32.mxu1 %v2917_v58 }
 0x1b4   :  { %2688 = vmatprep.subr.bf16.mxu0 %v2687_v34  ;;  %2712 = vmatprep.subr.bf16.mxu1 %v2711_v16 }
 0x1b5   :  { %1462 = vmatmul.mubr.f32.gmra.mrb[6].mxu0 %v1461_v42  ;;  %2002 = vmatmul.mubr.f32.gmra.mrb[6].mxu1 %v1461_v42 }
 0x1b6   :  { %1552 = vmatprep.mubr.f32.mxu0 %v2917_v58  ;;  %2092 = vmatprep.mubr.f32.mxu1 %v2917_v58 }
 0x1b9   :  { %1554 = vmatmul.mubr.f32.vlgmr.msra.gmra.mrb[4].mxu0 %v3473_v49  ;;  %2094 = vmatmul.mubr.f32.vlgmr.msra.gmra.mrb[4].mxu1 %v3473_v49 }
 0x1ba   :  { %2690 = vmatpush1.bf16.msra.mxu0 %v2689_v43  ;;  %2714 = vmatpush1.bf16.msra.mxu1 %v2713_v37 }
 0x1bb   :  { %1559 = vmatprep.mubr.f32.mxu0 %v2917_v58  ;;  %2099 = vmatprep.mubr.f32.mxu1 %v2917_v58 }
 0x1bc   :  { %2692 = vmatprep.subr.msk.bf16.mxu0 %vm3353_vm7, %v2918_v15  ;;  %2716 = vmatprep.subr.msk.bf16.mxu1 %vm3379_vm8, %v2918_v15 }
 0x1bd   :  { %1561 = vmatmul.mubr.f32.gmra.mrb[6].mxu0 %v3448_v36  ;;  %2101 = vmatmul.mubr.f32.gmra.mrb[6].mxu1 %v3448_v36 }
 0x1be   :  { %1639 = vmatprep.mubr.f32.mxu0 %v2917_v58  ;;  %2179 = vmatprep.mubr.f32.mxu1 %v2917_v58 }
 0x1c1   :  { %1642 = vmatmul.mubr.f32.vlgmr.msra.gmra.mrb[4].mxu0 %v1447_v51  ;;  %2182 = vmatmul.mubr.f32.vlgmr.msra.gmra.mrb[4].mxu1 %v1447_v51  ;;  %v2564_v51 = vsel %vm181_vm1, 1.0, %v2917_v58 }
 0x1c2   :  { %2694 = vmatpush1.bf16.msk.msra.mxu0 %vm3427_vm9, %v2918_v15  ;;  %2718 = vmatpush1.bf16.msk.msra.mxu1 %vm3435_vm10, %v2918_v15 }
 0x1c3   :  { %1647 = vmatprep.mubr.f32.mxu0 %v2917_v58  ;;  %2187 = vmatprep.mubr.f32.mxu1 %v2917_v58 }
 0x1c4   :  { %2696 = vmatprep.subr.bf16.mxu0 %v2695_v40  ;;  %2720 = vmatprep.subr.bf16.mxu1 %v2719_v39 }
 0x1c5   :  { %1650 = vmatmul.mubr.f32.gmra.mrb[6].mxu0 %v1458_v52  ;;  %2190 = vmatmul.mubr.f32.gmra.mrb[6].mxu1 %v1458_v52 }
 0x1c6   :  { %1724 = vmatprep.mubr.f32.mxu0 %v2917_v58  ;;  %2264 = vmatprep.mubr.f32.mxu1 %v2917_v58 }
 0x1c9   :  { %1728 = vmatmul.mubr.f32.vlgmr.msra.gmra.mrb[4].mxu0 %v1448_v14  ;;  %2268 = vmatmul.mubr.f32.vlgmr.msra.gmra.mrb[4].mxu1 %v1448_v14 }
 0x1ca   :  { %2698 = vmatpush1.bf16.msra.mxu0 %v2697_v41  ;;  %2722 = vmatpush1.bf16.msra.mxu1 %v2721_v46 }
 0x1cb   :  { %1733 = vmatprep.mubr.f32.mxu0 %v2917_v58  ;;  %2273 = vmatprep.mubr.f32.mxu1 %v2917_v58 }
 0x1cc   :  { %2700 = vmatprep.subr.msk.bf16.mxu0 %vm3353_vm7, %v2918_v15  ;;  %2724 = vmatprep.subr.msk.bf16.mxu1 %vm3379_vm8, %v2918_v15 }
 0x1cd   :  { %1737 = vmatmul.mubr.f32.gmra.mrb[6].mxu0 %v1459_v50  ;;  %2277 = vmatmul.mubr.f32.gmra.mrb[6].mxu1 %v1459_v50 }
 0x1ce   :  { %1819 = vmatprep.mubr.f32.mxu0 %v2917_v58  ;;  %2359 = vmatprep.mubr.f32.mxu1 %v2917_v58 }
 0x1d1   :  { %1821 = vmatmul.mubr.f32.vlgmr.msra.gmra.mrb[4].mxu0 %v3473_v49  ;;  %2361 = vmatmul.mubr.f32.vlgmr.msra.gmra.mrb[4].mxu1 %v3473_v49 }
 0x1d2   :  { %2702 = vmatpush1.bf16.msk.msra.mxu0 %vm3427_vm9, %v2918_v15  ;;  %2726 = vmatpush1.bf16.msk.msra.mxu1 %vm3435_vm10, %v2918_v15 }
 0x1d3   :  { %1826 = vmatprep.mubr.f32.mxu0 %v2917_v58  ;;  %2366 = vmatprep.mubr.f32.mxu1 %v2917_v58 }
 0x1d5   :  { %1828 = vmatmul.mubr.f32.gmra.mrb[6].mxu0 %v3448_v36  ;;  %2368 = vmatmul.mubr.f32.gmra.mrb[6].mxu1 %v3448_v36 }
 0x1d6   :  { %1902 = vmatprep.mubr.f32.mxu0 %v2917_v58  ;;  %2442 = vmatprep.mubr.f32.mxu1 %v2917_v58 }
 0x1d9   :  { %1904 = vmatmul.mubr.f32.vlgmr.msra.gmra.mrb[4].mxu0 %v3473_v49  ;;  %2444 = vmatmul.mubr.f32.vlgmr.msra.gmra.mrb[4].mxu1 %v3473_v49 }
 0x1da   :  { %1909 = vmatprep.mubr.f32.mxu0 %v2917_v58  ;;  %2449 = vmatprep.mubr.f32.mxu1 %v2917_v58 }
 0x1dd   :  { %1911 = vmatmul.mubr.f32.gmra.mrb[6].mxu0 %v3448_v36  ;;  %2451 = vmatmul.mubr.f32.gmra.mrb[6].mxu1 %v3448_v36 }
 0x275   :  { %v817_v15 = vpop.f32.mrb[0].mxu0  ;;  %v1357_v47 = vpop.f32.mrb[0].mxu1 }
 0x276   :  { %v819_v48 = vpop.f32.mrb[1].mxu0  ;;  %v1359_v8 = vpop.f32.mrb[1].mxu1  ;;  %v2457_v45 = vmul.f32 %v2559_v63, %v817_v15  ;;  %v2459_v38 = vmul.f32 %v2561_v3, %v1357_v47 }
 0x277   :  { %v2458_v11 = vmul.f32 %v2560_v59, %v819_v48  ;;  %v2460_v18 = vmul.f32 %v2562_v60, %v1359_v8 }
 0x279   :  { %v824_v27 = vpop.f32.mrb[2].mxu0  ;;  %v1364_v28 = vpop.f32.mrb[2].mxu1 }
 0x27a   :  { %v826_v29 = vpop.f32.mrb[3].mxu0  ;;  %v1366_v53 = vpop.f32.mrb[3].mxu1  ;;  %v2461_v50 = vmul.f32 %v2563_v19, %v824_v27 }
 0x27b   :  { %v2462_v33 = vmul.f32 %v2564_v51, %v826_v29 }
 0x2ac   :  { %v1905_v35 = vpop.f32.mrb[4].mxu0  ;;  %v2445_v44 = vpop.f32.mrb[4].mxu1 }
 0x2ad   :  { %v2465_v36 = vmul.f32 %v3156_v4, %v1905_v35  ;;  %v2467_v7 = vmul.f32 %v3169_v0, %v2445_v44  ;;  %v1907_v26 = vpop.f32.mrb[5].mxu0  ;;  %v2447_v30 = vpop.f32.mrb[5].mxu1  ;;  %v2463_v0 = vmul.f32 %v2565_v20, %v1364_v28  ;;  %v2919_v28 = vmov 1966171168  }
 0x2ae   :  { %v2466_v49 = vmul.f32 %v3057_v9, %v1907_v26  ;;  %v2468_v52 = vmul.f32 %v3067_v12, %v2447_v30  ;;  %v2464_v12 = vmul.f32 %v2566_v61, %v1366_v53 }
 0x2af   :  { %v2473_v5 = vadd.f32 %v2465_v36, %v2457_v45  ;;  %v2475_v54 = vadd.f32 %v2467_v7, %v2459_v38 }
 0x2b0   :  { %v2474_v55 = vadd.f32 %v2466_v49, %v2458_v11  ;;  %v2476_v62 = vadd.f32 %v2468_v52, %v2460_v18  ;;  %v1912_v14 = vpop.f32.mrb[6].mxu0  ;;  %v2452_v4 = vpop.f32.mrb[6].mxu1 }
 0x2b1   :  { %v2469_v24 = vmul.f32 %v3162_v6, %v1912_v14  ;;  %v2471_v25 = vmul.f32 %v3175_v22, %v2452_v4  ;;  %v1914_v1 = vpop.f32.mrb[7].mxu0  ;;  %v2454_v9 = vpop.f32.mrb[7].mxu1 }
 0x2b2   :  { %v2470_v2 = vmul.f32 %v3060_v10, %v1914_v1  ;;  %v2472_v58 = vmul.f32 %v3070_v13, %v2454_v9  ;;  %v2516_v10 = vunpack.c.l.s4 %v2919_v28 }
 0x2b3   :  { %v2477_v34 = vadd.f32 %v2469_v24, %v2461_v50  ;;  %v2479_v16 = vadd.f32 %v2471_v25, %v2463_v0 }
 0x2b4   :  { %v2478_v42 = vadd.f32 %v2470_v2, %v2462_v33  ;;  %v2480_v43 = vadd.f32 %v2472_v58, %v2464_v12  ;;  %v2517_v63 = vunpack.c.0.s8 %v2516_v10 }
 0x2b5   :  { %v2481_v37 = vadd.f32 %v2477_v34, %v2473_v5  ;;  %v2495_v40 = vadd.f32 %v2479_v16, %v2475_v54 }
 0x2b6   :  { %v2488_v39 = vadd.f32 %v2478_v42, %v2474_v55  ;;  %v2502_v41 = vadd.f32 %v2480_v43, %v2476_v62  ;;  %v2520_v38 = vsub.s32 %v2517_v63, %v3028_v57 }
 0x2b7   :  { %v2482_v46 = vrot.slane %v2481_v37, 4  ;;  %v2496_v6 = vrot.slane %v2495_v40, 4 }
 0x2b8   :  { %v2489_v15 = vrot.slane %v2488_v39, 4  ;;  %v2503_v22 = vrot.slane %v2502_v41, 4 }
 0x2b9   :  { %v2483_v47 = vadd.f32 %v2482_v46, %v2481_v37  ;;  %v2497_v48 = vadd.f32 %v2496_v6, %v2495_v40 }
 0x2ba   :  { %v2490_v8 = vadd.f32 %v2489_v15, %v2488_v39  ;;  %v2504_v27 = vadd.f32 %v2503_v22, %v2502_v41 }
 0x2bb   :  { %v2484_v29 = vrot.slane %v2483_v47, 2  ;;  %v2498_v13 = vrot.slane %v2497_v48, 2 }
 0x2bc   :  { %v2491_v53 = vrot.slane %v2490_v8, 2  ;;  %v2505_v32 = vrot.slane %v2504_v27, 2 }
 0x2bd   :  { %v2485_v31 = vadd.f32 %v2484_v29, %v2483_v47  ;;  %v2499_v21 = vadd.f32 %v2498_v13, %v2497_v48 }
 0x2be   :  { %v2492_v23 = vadd.f32 %v2491_v53, %v2490_v8  ;;  %v2506_v17 = vadd.f32 %v2505_v32, %v2504_v27 }
 0x2bf   :  { %v2486_v3 = vrot.slane %v2485_v31, 1  ;;  %v2500_v59 = vrot.slane %v2499_v21, 1 }
 0x2c0   :  { %v2493_v60 = vrot.slane %v2492_v23, 1  ;;  %v2507_v19 = vrot.slane %v2506_v17, 1 }
 0x2c1   :  { %v2487_v20 = vadd.f32 %v2486_v3, %v2485_v31  ;;  %v2501_v35 = vadd.f32 %v2500_v59, %v2499_v21 }
 0x2c2   :  { %v2494_v44 = vadd.f32 %v2493_v60, %v2492_v23  ;;  %v2508_v45 = vadd.f32 %v2507_v19, %v2506_v17 }
 0x2c4   :  { %v2513_v36 = vcombine.low %v2487_v20, %v2494_v44  ;;  %v2514_v7 = vcombine.low %v2501_v35, %v2508_v45 }
 0x2c6   :  { %v2521_v26 = vrot.slane %v2513_v36, %v2520_v38  ;;  %v2528_v30 = vrot.slane %v2514_v7, %v2520_v38 }
 0x2c8   :  { %v2529_v11 = vcombine.low %v2521_v26, %v2528_v30 }
 0x2ca   :  { %v2536_v18 = vrot.slane %v2529_v11, %v2520_v38 }
 0x2cc   :  { %2542 = vst.msk [vmem:[#allocation9] sm:$0xf] %vm2540_vm3, %v2536_v18 }
 0x2cd   :  { %2895 = shalt.err (!%p2892_p6)
}
 0x2ce   :  { %s2896_s24 = scalar_lea.hbm %s3606_s4, 64 }
 0x2cf   :  { %p2897_p7 = scmp.ne.s32.totalorder %s3606_s4, %s2896_s24  ;;  %p2900_p8 = scmp.lt.u32.totalorder %s2896_s24, %s3606_s4 }
 0x2d1   :  { %p2902_p9 = pnand %p2900_p8, %p2897_p7 }
 0x2d3   :  { %2905 = shalt.err (!%p2902_p9)
}
 0x2d4   :  { %2552 = dma.vmem_to_hbm [thread:$0]  %s2550_s20, 64, %s3606_s4, [#allocation6]  }
 0x2d5   :  { %2910 = dma.done.wait [#allocation6], 64  }
 0x2d6   :  { %2911 = vsyncadd [#allocation6], 4294967232 }
 0x2d7   :  { %2556 = vsyncpa [#allocation5], 1 }
 0x2d8   :  { %2557 = vsyncpa [#allocation8], 1 }
 0x2d9   :  { %2558 = vsyncpa [#allocation6], 1 }

</bundles_post_ra>
